<compile_context>
chip_gen: v5e
topology: v5e:2x2
jax: 0.10.0
libtpu: 0.0.40
codegen_flags: <defaults>
</compile_context>

<pallas_src>
import math
from functools import partial

import jax
import jax.numpy as jnp
from jax import lax
from jax.experimental import pallas as pl
from jax.experimental.pallas import tpu as pltpu


def _round_up(x, m):
    return (x + m - 1) // m * m


def _mxu_is_narrow():
    """True on chips with 128-wide MXUs (<= v5); False (256-wide) on v6e/v7x."""
    try:
        kind = jax.devices()[0].device_kind.lower()
    except Exception:
        return False
    return any(tag in kind for tag in ("v2", "v3", "v4", "v5"))


# ---------------------------------------------------------------------------
# Kernel: one (batch, Cout-tile, M-tile) output block per grid step.
#   x_ref : (1, Hq, Wq, C2p) bf16  -- whole space-to-depth image (C2p = s*s*Cin pad)
#   w_ref : (4, C2p, tn)     bf16  -- folded weights for the 4 (dy,dx) taps
#   b_ref : (1, tn)          f32   -- bias slice
#   o_ref : (1, th*Wo, tn)   f32   -- output block (th output rows)
# The 4 taps are unrolled with static (dy, dx) slices; everything accumulates
# in f32 values (no scratch, no reduction grid axis, single o_ref write).
# ---------------------------------------------------------------------------
def _ope_kernel(x_ref, w_ref, b_ref, o_ref, *, th, out_w):
    mi = pl.program_id(2)            # M-tile index (output rows [mi*th, mi*th+th))
    row0 = mi * th
    m = th * out_w
    c2p = x_ref.shape[-1]

    acc = None
    for dy in (0, 1):                # static unroll of the 2x2 folded taps
        for dx in (0, 1):
            patch = x_ref[0, pl.ds(row0 + dy, th), pl.ds(dx, out_w), :]
            a2d = patch.reshape(m, c2p)                       # lane-dense LHS
            part = jnp.dot(a2d, w_ref[2 * dy + dx],
                           preferred_element_type=jnp.float32)
            acc = part if acc is None else acc + part

    o_ref[0] = (acc + b_ref[...]).astype(o_ref.dtype)


# ---------------------------------------------------------------------------
# Wrapper: NCHW in / NCHW out, identical semantics to the PyTorch module.
# ---------------------------------------------------------------------------
@partial(jax.jit, static_argnums=(3,))
def overlapping_patch_embed(x_nchw, weight, bias, stride):
    B, Cin, H, W = x_nchw.shape
    Cout = weight.shape[0]
    s = int(stride)
    K = 2 * s - 1
    pad = K // 2                               # = s - 1
    Ho = (H + 2 * pad - K) // s + 1            # = ceil(H / s)
    Wo = (W + 2 * pad - K) // s + 1

    # ---- tile choices -----------------------------------------------------
    tn = 128 if (Cout <= 128 or _mxu_is_narrow()) else 256     # lane-dense N tile
    Cout_p = _round_up(Cout, tn)
    C2 = s * s * Cin
    C2p = _round_up(C2, 128)                   # lane-dense folded contraction dim

    # Output-row tile th (tm = th*Wo flattened rows): keep each f32 output
    # block around <= 4 MiB so double-buffered output fits v7x's 64 MiB VMEM.
    row_bytes = Wo * tn * 4
    th = max(1, min(Ho, (4 << 20) // max(row_bytes, 1)))
    if th < Ho:
        mult = 8 // math.gcd(Wo, 8)            # keep th*Wo a multiple of 8 (sublane)
        th = max(mult, (th // mult) * mult)
    n_mt = -(-Ho // th)
    if n_mt <= 1:
        th, n_mt = Ho, 1
    Ho_p = n_mt * th
    tm = th * Wo
    Hq, Wq = Ho_p + 1, Wo + 1                  # +1 block row/col for the dy/dx=1 taps

    # ---- host-side layout glue (one ~1x copy, no K^2 im2col blow-up) -------
    x = jnp.transpose(x_nchw, (0, 2, 3, 1))                        # NCHW -> NHWC
    xpad = jnp.pad(x, ((0, 0), (pad, Hq * s - pad - H),
                       (pad, Wq * s - pad - W), (0, 0)))
    # space-to-depth: (B, Hq*s, Wq*s, Cin) -> (B, Hq, Wq, s*s*Cin), channel = (py,px,c)
    xs2d = xpad.reshape(B, Hq, s, Wq, s, Cin).transpose(0, 1, 3, 2, 4, 5)
    xs2d = xs2d.reshape(B, Hq, Wq, C2)
    xs2d = jnp.pad(xs2d, ((0, 0), (0, 0), (0, 0),
                          (0, C2p - C2))).astype(jnp.bfloat16)

    # Fold the K*K conv taps into 4 (dy,dx) taps over s*s*Cin folded channels.
    # Tap (dy,dx), folded channel (py,px,c) <- W[o, c, dy*s+py, dx*s+px]
    # (zero when dy*s+py or dx*s+px >= K, i.e. the phase s-1 of the "+1" tap).
    w_hwio = jnp.transpose(weight, (2, 3, 1, 0))                   # (K, K, Cin, Cout)
    w_pad = jnp.pad(w_hwio, ((0, 2 * s - K), (0, 2 * s - K), (0, 0), (0, 0)))
    w_t = w_pad.reshape(2, s, 2, s, Cin, Cout).transpose(0, 2, 1, 3, 4, 5)
    w_t = w_t.reshape(4, C2, Cout)
    w_t = jnp.pad(w_t, ((0, 0), (0, C2p - C2),
                        (0, Cout_p - Cout))).astype(jnp.bfloat16)
    bias_p = jnp.pad(bias.astype(jnp.float32), (0, Cout_p - Cout)).reshape(1, Cout_p)

    grid = (B, Cout_p // tn, n_mt)             # (parallel, parallel, parallel)

    # VMEM budget derived from actual block sizes (+ kernel temporaries),
    # clamped to a v7x-safe ceiling.
    xb = Hq * Wq * C2p * 2
    wb = 4 * C2p * tn * 2
    bb = tn * 4
    ob = tm * tn * 4
    interm = 4 * tm * C2p * 2 + ob + (th + 1) * Wq * C2p * 2
    vmem_limit = int(min(max(2 * (xb + wb + bb + ob) + interm + (4 << 20),
                             24 << 20), 56 << 20))

    out = pl.pallas_call(
        partial(_ope_kernel, th=th, out_w=Wo),
        out_shape=jax.ShapeDtypeStruct((B, Ho_p * Wo, Cout_p), jnp.float32),
        grid=grid,
        in_specs=[
            # whole space-to-depth image; constant over (n, mi) -> DMA'd once per image
            pl.BlockSpec((1, Hq, Wq, C2p), lambda b, n, mi: (b, 0, 0, 0)),
            # whole 4-tap weight slab for this Cout tile; constant over (b, mi)
            pl.BlockSpec((4, C2p, tn), lambda b, n, mi: (0, 0, n)),
            pl.BlockSpec((1, tn), lambda b, n, mi: (0, n)),
        ],
        out_specs=pl.BlockSpec((1, tm, tn), lambda b, n, mi: (b, mi, n)),
        compiler_params=pltpu.CompilerParams(
            dimension_semantics=("parallel", "parallel", "parallel"),
            vmem_limit_bytes=vmem_limit,
        ),
    )(xs2d, w_t, bias_p)

    out = out[:, :Ho * Wo, :Cout].reshape(B, Ho, Wo, Cout)
    return jnp.transpose(out, (0, 3, 1, 2))    # NHWC -> NCHW


# ---------------------------------------------------------------------------
# Demo / self-test
# ---------------------------------------------------------------------------
if __name__ == "__main__":
    root = jax.random.PRNGKey(0)

    def make_params(key, dim_in, dim_out, stride):
        k = 2 * stride - 1
        bound = 1.0 / math.sqrt(dim_in * k * k)   # torch Conv2d default init range
        kw, kb = jax.random.split(key)
        w = jax.random.uniform(kw, (dim_out, dim_in, k, k), jnp.float32, -bound, bound)
        b = jax.random.uniform(kb, (dim_out,), jnp.float32, -bound, bound)
        return w, b

    def reference(x, w, b, stride):
        pad = (2 * stride - 1) // 2
        y = lax.conv_general_dilated(
            x, w, (stride, stride), ((pad, pad), (pad, pad)),
            dimension_numbers=("NCHW", "OIHW", "NCHW"),
            preferred_element_type=jnp.float32)
        return y + b[None, :, None, None]

    k1, k2, k3, k4 = jax.random.split(root, 4)

    # Case 1: dim_in=4 -> dim_out=32, stride=2 (3x3 kernel), input (2, 4, 16, 16).
    x1 = jax.random.normal(k1, (2, 4, 16, 16), jnp.float32)
    w1, b1 = make_params(k2, 4, 32, 2)
    y1 = jax.block_until_ready(overlapping_patch_embed(x1, w1, b1, 2))
    assert y1.shape == (2, 32, 8, 8), y1.shape
    r1 = reference(x1.astype(jnp.bfloat16).astype(jnp.float32),
                   w1.astype(jnp.bfloat16).astype(jnp.float32), b1, 2)
    assert jnp.allclose(y1, r1, atol=5e-3, rtol=5e-3), float(jnp.max(jnp.abs(y1 - r1)))

    # Case 2: first-stage style stride=4 (7x7 kernel), dim_in=3 -> dim_out=32.
    x2 = jax.random.normal(k3, (2, 3, 16, 16), jnp.float32)
    w2, b2 = make_params(k4, 3, 32, 4)
    y2 = jax.block_until_ready(overlapping_patch_embed(x2, w2, b2, 4))
    assert y2.shape == (2, 32, 4, 4), y2.shape
    r2 = reference(x2.astype(jnp.bfloat16).astype(jnp.float32),
                   w2.astype(jnp.bfloat16).astype(jnp.float32), b2, 4)
    assert jnp.allclose(y2, r2, atol=5e-3, rtol=5e-3), float(jnp.max(jnp.abs(y2 - r2)))

    assert bool(jnp.all(jnp.isfinite(y1))) and bool(jnp.all(jnp.isfinite(y2)))
    print("KERNEL_OK")
</pallas_src>

<mosaic_0001>
module attributes {stable_mosaic.version = 11 : i64} {
  func.func @_ope_kernel(%arg0: i32, %arg1: i32, %arg2: i32, %arg3: memref<1x9x9x128xbf16, #tpu.memory_space<vmem>>, %arg4: memref<4x128x128xbf16, #tpu.memory_space<vmem>>, %arg5: memref<1x128xf32, #tpu.memory_space<vmem>>, %arg6: memref<1x64x128xf32, #tpu.memory_space<vmem>>) attributes {dimension_semantics = [#tpu.dimension_semantics<parallel>, #tpu.dimension_semantics<parallel>, #tpu.dimension_semantics<parallel>], iteration_bounds = array<i64: 2, 1, 1>, scalar_prefetch = 0 : i64, scratch_operands = 0 : i64, tpu.core_type = #tpu.core_type<tc>, window_params = [{transform_indices = @transform_0, window_bounds = array<i64: 1, 9, 9, 128>}, {transform_indices = @transform_1, window_bounds = array<i64: 4, 128, 128>}, {transform_indices = @transform_2, window_bounds = array<i64: 1, 128>}, {transform_indices = @transform_3, window_bounds = array<i64: 1, 64, 128>}]} {
    %c8_i32 = arith.constant 8 : i32
    %0 = arith.muli %arg2, %c8_i32 : i32
    %c0_i32 = arith.constant 0 : i32
    %1 = arith.addi %0, %c0_i32 : i32
    %c0 = arith.constant 0 : index
    %2 = arith.index_cast %1 : i32 to index
    %c0_0 = arith.constant 0 : index
    %c0_1 = arith.constant 0 : index
    %3 = vector.load %arg3[%c0, %2, %c0_0, %c0_1] : memref<1x9x9x128xbf16, #tpu.memory_space<vmem>>, vector<1x8x8x128xbf16>
    %4 = vector.shape_cast %3 : vector<1x8x8x128xbf16> to vector<8x8x128xbf16>
    %5 = vector.shape_cast %4 : vector<8x8x128xbf16> to vector<64x128xbf16>
    %c0_2 = arith.constant 0 : index
    %c0_3 = arith.constant 0 : index
    %c0_4 = arith.constant 0 : index
    %6 = vector.load %arg4[%c0_2, %c0_3, %c0_4] : memref<4x128x128xbf16, #tpu.memory_space<vmem>>, vector<1x128x128xbf16>
    %7 = vector.shape_cast %6 : vector<1x128x128xbf16> to vector<128x128xbf16>
    %cst = arith.constant dense<0.000000e+00> : vector<64x128xf32>
    %8 = tpu.matmul %5, %7, %cst {dimension_numbers = #tpu.dot_dimension_numbers<[1], [0], [0], [1], [0, 0, 1, 1], [], []>} : vector<64x128xbf16>, vector<128x128xbf16>, vector<64x128xf32> -> vector<64x128xf32>
    %c0_i32_5 = arith.constant 0 : i32
    %9 = arith.addi %0, %c0_i32_5 : i32
    %c0_6 = arith.constant 0 : index
    %10 = arith.index_cast %9 : i32 to index
    %c1 = arith.constant 1 : index
    %c0_7 = arith.constant 0 : index
    %11 = vector.load %arg3[%c0_6, %10, %c1, %c0_7] : memref<1x9x9x128xbf16, #tpu.memory_space<vmem>>, vector<1x8x8x128xbf16>
    %12 = vector.shape_cast %11 : vector<1x8x8x128xbf16> to vector<8x8x128xbf16>
    %13 = vector.shape_cast %12 : vector<8x8x128xbf16> to vector<64x128xbf16>
    %c1_8 = arith.constant 1 : index
    %c0_9 = arith.constant 0 : index
    %c0_10 = arith.constant 0 : index
    %14 = vector.load %arg4[%c1_8, %c0_9, %c0_10] : memref<4x128x128xbf16, #tpu.memory_space<vmem>>, vector<1x128x128xbf16>
    %15 = vector.shape_cast %14 : vector<1x128x128xbf16> to vector<128x128xbf16>
    %cst_11 = arith.constant dense<0.000000e+00> : vector<64x128xf32>
    %16 = tpu.matmul %13, %15, %cst_11 {dimension_numbers = #tpu.dot_dimension_numbers<[1], [0], [0], [1], [0, 0, 1, 1], [], []>} : vector<64x128xbf16>, vector<128x128xbf16>, vector<64x128xf32> -> vector<64x128xf32>
    %17 = arith.addf %8, %16 : vector<64x128xf32>
    %c1_i32 = arith.constant 1 : i32
    %18 = arith.addi %0, %c1_i32 : i32
    %c0_12 = arith.constant 0 : index
    %19 = arith.index_cast %18 : i32 to index
    %c0_13 = arith.constant 0 : index
    %c0_14 = arith.constant 0 : index
    %20 = vector.load %arg3[%c0_12, %19, %c0_13, %c0_14] : memref<1x9x9x128xbf16, #tpu.memory_space<vmem>>, vector<1x8x8x128xbf16>
    %21 = vector.shape_cast %20 : vector<1x8x8x128xbf16> to vector<8x8x128xbf16>
    %22 = vector.shape_cast %21 : vector<8x8x128xbf16> to vector<64x128xbf16>
    %c2 = arith.constant 2 : index
    %c0_15 = arith.constant 0 : index
    %c0_16 = arith.constant 0 : index
    %23 = vector.load %arg4[%c2, %c0_15, %c0_16] : memref<4x128x128xbf16, #tpu.memory_space<vmem>>, vector<1x128x128xbf16>
    %24 = vector.shape_cast %23 : vector<1x128x128xbf16> to vector<128x128xbf16>
    %cst_17 = arith.constant dense<0.000000e+00> : vector<64x128xf32>
    %25 = tpu.matmul %22, %24, %cst_17 {dimension_numbers = #tpu.dot_dimension_numbers<[1], [0], [0], [1], [0, 0, 1, 1], [], []>} : vector<64x128xbf16>, vector<128x128xbf16>, vector<64x128xf32> -> vector<64x128xf32>
    %26 = arith.addf %17, %25 : vector<64x128xf32>
    %c1_i32_18 = arith.constant 1 : i32
    %27 = arith.addi %0, %c1_i32_18 : i32
    %c0_19 = arith.constant 0 : index
    %28 = arith.index_cast %27 : i32 to index
    %c1_20 = arith.constant 1 : index
    %c0_21 = arith.constant 0 : index
    %29 = vector.load %arg3[%c0_19, %28, %c1_20, %c0_21] : memref<1x9x9x128xbf16, #tpu.memory_space<vmem>>, vector<1x8x8x128xbf16>
    %30 = vector.shape_cast %29 : vector<1x8x8x128xbf16> to vector<8x8x128xbf16>
    %31 = vector.shape_cast %30 : vector<8x8x128xbf16> to vector<64x128xbf16>
    %c3 = arith.constant 3 : index
    %c0_22 = arith.constant 0 : index
    %c0_23 = arith.constant 0 : index
    %32 = vector.load %arg4[%c3, %c0_22, %c0_23] : memref<4x128x128xbf16, #tpu.memory_space<vmem>>, vector<1x128x128xbf16>
    %33 = vector.shape_cast %32 : vector<1x128x128xbf16> to vector<128x128xbf16>
    %cst_24 = arith.constant dense<0.000000e+00> : vector<64x128xf32>
    %34 = tpu.matmul %31, %33, %cst_24 {dimension_numbers = #tpu.dot_dimension_numbers<[1], [0], [0], [1], [0, 0, 1, 1], [], []>} : vector<64x128xbf16>, vector<128x128xbf16>, vector<64x128xf32> -> vector<64x128xf32>
    %35 = arith.addf %26, %34 : vector<64x128xf32>
    %c0_25 = arith.constant 0 : index
    %c0_26 = arith.constant 0 : index
    %36 = vector.load %arg5[%c0_25, %c0_26] : memref<1x128xf32, #tpu.memory_space<vmem>>, vector<1x128xf32>
    %37 = vector.broadcast %36 : vector<1x128xf32> to vector<64x128xf32>
    %38 = arith.addf %35, %37 : vector<64x128xf32>
    %c0_27 = arith.constant 0 : index
    %c0_28 = arith.constant 0 : index
    %c0_29 = arith.constant 0 : index
    %39 = vector.load %arg6[%c0_27, %c0_28, %c0_29] : memref<1x64x128xf32, #tpu.memory_space<vmem>>, vector<1x64x128xf32>
    %40 = vector.shape_cast %39 : vector<1x64x128xf32> to vector<64x128xf32>
    %41 = vector.shape_cast %38 : vector<64x128xf32> to vector<1x64x128xf32>
    tpu.vector_store %arg6[%c0_27, %c0_28, %c0_29], %41 {strides = array<i32>} : memref<1x64x128xf32, #tpu.memory_space<vmem>>, vector<1x64x128xf32>,
    return
  }
  func.func @transform_0(%arg0: i32, %arg1: i32, %arg2: i32) -> (i32, i32, i32, i32) {
    %c0_i32 = arith.constant 0 : i32
    %c0_i32_0 = arith.constant 0 : i32
    %c0_i32_1 = arith.constant 0 : i32
    %c0_i32_2 = arith.constant 0 : i32
    return %arg0, %c0_i32, %c0_i32_0, %c0_i32_1 : i32, i32, i32, i32
  }
  func.func @transform_1(%arg0: i32, %arg1: i32, %arg2: i32) -> (i32, i32, i32) {
    %c0_i32 = arith.constant 0 : i32
    %c0_i32_0 = arith.constant 0 : i32
    %c0_i32_1 = arith.constant 0 : i32
    return %c0_i32, %c0_i32_0, %arg1 : i32, i32, i32
  }
  func.func @transform_2(%arg0: i32, %arg1: i32, %arg2: i32) -> (i32, i32) {
    %c0_i32 = arith.constant 0 : i32
    %c0_i32_0 = arith.constant 0 : i32
    return %c0_i32, %arg1 : i32, i32
  }
  func.func @transform_3(%arg0: i32, %arg1: i32, %arg2: i32) -> (i32, i32, i32) {
    %c0_i32 = arith.constant 0 : i32
    return %arg0, %arg2, %arg1 : i32, i32, i32
  }
}

</mosaic_0001>

<bundles_post_ra>
// kernel: overlapping_patch_embed.1
= control target key start
LH: loop header
LB: loop body
LE: loop exit
PB: predicated region body
PF: predicated region fallthrough
CT: control target
= control target key end

     0   :  { %s1488_s12 = smov 0   ;;  %s1490_s13 = smov 0   ;;  %s1732_s0 = inlined_call_operand.vmem [shape: bf16[2,9,9,128], index: 0, kind: input, shape index: {}]   ;;  %s1733_s1 = inlined_call_operand.vmem [shape: bf16[4,128,128], index: 1, kind: input, shape index: {}]   ;;  %s1734_s2 = inlined_call_operand.vmem [shape: f32[1,128], index: 2, kind: input, shape index: {}]   ;;  %s1735_s3 = inlined_call_operand.vmem [shape: f32[2,64,128], index: 3, kind: output, shape index: {}]  }
   0x1   :  { %s1492_s14 = smov 0  }
   0x2 LB: > { %s32_s15 = sadd.s32 1, %s1462_s13  ;;  %p1139_p0 = scmp.ge.s32.totalorder %s1466_s14, 1  ;;  %s1466_s14 = sphi %s1492_s14, %s13_s14   ;;  %s1462_s13 = sphi %s1490_s13, %s1739_s13   ;;  %s1458_s12 = sphi %s1488_s12, %s1738_s12  }
   0x3   : > { %p34_p1 = scmp.ge.s32.totalorder %s32_s15, 2  ;;  %p177_p2 = scmp.lt.s32.totalorder %s1466_s14, 3 }
   0x5   : > { %s1741_s15 = smov (%p34_p1, %s32_s15), 0  ;;  %p178_p3 = pnand %p1139_p0, %p177_p2 }
   0x6   : > { %p215_p4 = scmp.lt.s32.totalorder (!%p178_p3), %s1458_s12, 1 }
   0x7   : > { %181 = sbr.rel (%p178_p3) target bundleno = 241 (0xf1), region = 32 }
   0xc   : > { %v1397_v0 = vld [vmem:[%s1733_s1 + $0x78] sm:$0xff]  ;;  %v1396_v4 = vld [vmem:[%s1733_s1 + $0x70] sm:$0xff]  ;;  %s1743_s12 = smov (!%p215_p4, %s1458_s12), 1  ;;  %v1395_v8 = vld [vmem:[%s1733_s1 + $0x68] sm:$0xff]  ;;  %vm276_vm0 = vsmask.f32 3328 }
   0xd   : > { %v1389_v1 = vld [vmem:[%s1733_s1 + $0x38] sm:$0xff]  ;;  %472 = vmatpush.bf16.msra.mxu0 %v1397_v0  ;;  %v1388_v5 = vld [vmem:[%s1733_s1 + $0x30] sm:$0xff]  ;;  %s1418_s5 = smul.u32 72, %s1743_s12  ;;  %v1387_v9 = vld [vmem:[%s1733_s1 + $0x28] sm:$0xff]  ;;  %vm277_vm1 = vsmask.f32 7440 }
   0xe   : > { %v1409_v2 = vld [vmem:[%s1733_s1 + $0xb8] sm:$0xff]  ;;  %573 = vmatpush.bf16.msra.mxu1 %v1389_v1  ;;  %v1408_v6 = vld [vmem:[%s1733_s1 + $0xb0] sm:$0xff]  ;;  %v1407_v10 = vld [vmem:[%s1733_s1 + $0xa8] sm:$0xff]  ;;  %s1377_s16 = sshll.u32 %s1743_s12, 6 }
   0xf   : > { %v1417_v3 = vld [vmem:[%s1733_s1 + $0xf8] sm:$0xff]  ;;  %703 = vmatpush.bf16.msra.mxu2 %v1409_v2  ;;  %v1416_v7 = vld [vmem:[%s1733_s1 + $0xf0] sm:$0xff]  ;;  %v1415_v11 = vld [vmem:[%s1733_s1 + $0xe8] sm:$0xff]  ;;  %s1548_s20 = scalar_lea.vmem %s1732_s0, %s1418_s5  ;;  %s1705_s21 = scalar_lea.vmem %s1735_s3, %s1377_s16 }
  0x10   : > { %949 = vmatpush.bf16.msra.mxu3 %v1417_v3  ;;  %v1394_v12 = vld [vmem:[%s1733_s1 + $0x60] sm:$0xff]  ;;  %v245_v17 = vld [vmem:[%s1548_s20 + $0x8] sm:$0xf]  ;;  %v269_v19 = vld [vmem:[%s1548_s20 + $0xc] sm:$0x1] }
  0x11   : > { %473 = vmatpush.bf16.msra.mxu0 %v1396_v4  ;;  %v1386_v13 = vld [vmem:[%s1733_s1 + $0x20] sm:$0xff]  ;;  %v294_v23 = vshrl.u32 %v245_v17, 16  ;;  %v1393_v24 = vld [vmem:[%s1733_s1 + $0x58] sm:$0xff]  ;;  %v297_v26 = vshll.u32 %v245_v17, 16  ;;  %v303_v27 = vshll.u32 %v269_v19, 16  ;;  %vm1584_vm2 = vmor %vm276_vm0, %vm277_vm1 }
  0x12   : > { %574 = vmatpush.bf16.msra.mxu1 %v1388_v5  ;;  %v1406_v14 = vld [vmem:[%s1733_s1 + $0xa0] sm:$0xff]  ;;  %v1385_v25 = vld [vmem:[%s1733_s1 + $0x18] sm:$0xff]  ;;  %v1311_v36 = vld [vmem:[%s1548_s20 + $0x8] sm:$0xf] }
  0x13   : > { %704 = vmatpush.bf16.msra.mxu2 %v1408_v6  ;;  %v1414_v15 = vld [vmem:[%s1733_s1 + $0xe0] sm:$0xff]  ;;  %v1405_v28 = vld [vmem:[%s1733_s1 + $0x98] sm:$0xff]  ;;  %v296_v33 = vrot.slane %v294_v23, 4  ;;  %v299_v34 = vrot.slane %v297_v26, 5  ;;  %v305_v35 = vrot.slane %v303_v27, 5  ;;  %v757_v41 = vshrl.u32 %v1311_v36, 16 }
  0x14   : > { %950 = vmatpush.bf16.msra.mxu3 %v1416_v7  ;;  %v244_v16 = vld [vmem:[%s1548_s20] sm:$0xf]  ;;  %v268_v18 = vld [vmem:[%s1548_s20 + $0x4] sm:$0x1]  ;;  %v1413_v29 = vld [vmem:[%s1733_s1 + $0xd8] sm:$0xff]  ;;  %v760_v42 = vshll.u32 %v1311_v36, 16 }
  0x15   : > { %474 = vmatpush.bf16.msra.mxu0 %v1395_v8  ;;  %v280_v20 = vshrl.u32 %v244_v16, 16  ;;  %v283_v21 = vshll.u32 %v244_v16, 16  ;;  %v289_v22 = vshll.u32 %v268_v18, 16  ;;  %v1312_v37 = vld [vmem:[%s1548_s20 + $0xc] sm:$0x1]  ;;  %v300_v44 = vor.u32 %v299_v34, %v296_v33  ;;  %v1392_v49 = vld [vmem:[%s1733_s1 + $0x50] sm:$0xff] }
  0x16   : > { %575 = vmatpush.bf16.msra.mxu1 %v1387_v9  ;;  %v1313_v39 = vld [vmem:[%s1548_s20 + $0x10] sm:$0xf]  ;;  %v1314_v40 = vld [vmem:[%s1548_s20 + $0x14] sm:$0x1]  ;;  %v766_v45 = vshll.u32 %v1312_v37, 16  ;;  %v759_v52 = vrot.slane %v757_v41, 4 }
  0x17   : > { %705 = vmatpush.bf16.msra.mxu2 %v1407_v10  ;;  %v282_v30 = vrot.slane %v280_v20, 4  ;;  %v285_v31 = vrot.slane %v283_v21, 5  ;;  %v291_v32 = vrot.slane %v289_v22, 5  ;;  %v771_v46 = vshrl.u32 %v1313_v39, 16  ;;  %v246_v48 = vld [vmem:[%s1548_s20 + $0x10] sm:$0xf] }
  0x18   : > { %951 = vmatpush.bf16.msra.mxu3 %v1415_v11  ;;  %v774_v47 = vshll.u32 %v1313_v39, 16  ;;  %v1384_v50 = vld [vmem:[%s1733_s1 + $0x10] sm:$0xff]  ;;  %v762_v53 = vrot.slane %v760_v42, 5  ;;  %v780_v54 = vshll.u32 %v1314_v40, 16  ;;  %v301_v57 = vrot.slane %v300_v44, 4  ;;  %v1391_v1 = vld [vmem:[%s1733_s1 + $0x48] sm:$0xff] }
  0x19   : > { %475 = vmatpush.bf16.msra.mxu0 %v1394_v12  ;;  %v286_v38 = vor.u32 %v285_v31, %v282_v30  ;;  %v1404_v55 = vld [vmem:[%s1733_s1 + $0x90] sm:$0xff]  ;;  %v773_v58 = vrot.slane %v771_v46, 4  ;;  %v768_v62 = vrot.slane %v766_v45, 5  ;;  %v247_v63 = vld [vmem:[%s1548_s20 + $0x18] sm:$0xf]  ;;  %v308_v0 = vshrl.u32 %v246_v48, 16 }
  0x1a   : > { %576 = vmatpush.bf16.msra.mxu1 %v1386_v13  ;;  %v1412_v56 = vld [vmem:[%s1733_s1 + $0xd0] sm:$0xff]  ;;  %v776_v59 = vrot.slane %v774_v47, 5  ;;  %v763_v61 = vor.u32 %v762_v53, %v759_v52  ;;  %v306_v2 = vsel %vm1584_vm2, %v301_v57, %v305_v35  ;;  %v782_v4 = vrot.slane %v780_v54, 5  ;;  %v1383_v6 = vld [vmem:[%s1733_s1 + $0x8] sm:$0xff]  ;;  %v1193_v8 = vld [vmem:[%s1548_s20] sm:$0xf] }
  0x1b   : > { %706 = vmatpush.bf16.msra.mxu2 %v1406_v14  ;;  %v287_v51 = vrot.slane %v286_v38, 4  ;;  %v311_v5 = vshll.u32 %v246_v48, 16  ;;  %v1403_v7 = vld [vmem:[%s1733_s1 + $0x88] sm:$0xff]  ;;  %v322_v14 = vshrl.u32 %v247_v63, 16  ;;  %v409_v16 = vunpack.c.l.b16 %v306_v2  ;;  %v270_v18 = vld [vmem:[%s1548_s20 + $0x14] sm:$0x1] }
  0x1c   : > { %952 = vmatpush.bf16.msra.mxu3 %v1414_v15  ;;  %v777_v3 = vor.u32 %v776_v59, %v773_v58  ;;  %v764_v9 = vrot.slane %v763_v61, 4  ;;  %v1411_v10 = vld [vmem:[%s1733_s1 + $0xc8] sm:$0xff]  ;;  %v325_v15 = vshll.u32 %v247_v63, 16  ;;  %v310_v19 = vrot.slane %v308_v0, 4  ;;  %v1315_v21 = vld [vmem:[%s1548_s20 + $0x18] sm:$0xf] }
  0x1d   : > { %476 = vmatpush.bf16.msra.mxu0 %v1393_v24  ;;  %v292_v60 = vsel %vm1584_vm2, %v287_v51, %v291_v32  ;;  %v1378_v12 = vld [vmem:[%s1548_s20 + $0x4] sm:$0xf0]  ;;  %v313_v20 = vrot.slane %v311_v5, 5  ;;  %v1390_v22 = vld [vmem:[%s1733_s1 + $0x40] sm:$0xff]  ;;  %v271_v24 = vld [vmem:[%s1548_s20 + $0x1c] sm:$0x1] }
  0x1e   : > { %577 = vmatpush.bf16.msra.mxu1 %v1385_v25  ;;  %v408_v11 = vunpack.c.l.b16 %v292_v60  ;;  %v778_v13 = vrot.slane %v777_v3, 4  ;;  %v769_v17 = vsel %vm1584_vm2, %v764_v9, %v768_v62  ;;  %v324_v25 = vrot.slane %v322_v14, 4  ;;  %v1317_v26 = vld [vmem:[%s1548_s20 + $0x20] sm:$0xf]  ;;  %v1398_v35 = vld [vmem:[%s1548_s20 + $0xc] sm:$0xf0] }
  0x1f   : > { %707 = vmatpush.bf16.msra.mxu2 %v1405_v28  ;;  %v1382_v27 = vld [vmem:[%s1733_s1] sm:$0xff]  ;;  %v885_v30 = vunpack.c.l.b16 %v769_v17  ;;  %v327_v32 = vrot.slane %v325_v15, 5  ;;  %v1194_v34 = vor.u32 %v1378_v12, %v1193_v8  ;;  %v317_v36 = vshll.u32 %v270_v18, 16  ;;  %v1316_v42 = vld [vmem:[%s1548_s20 + $0x1c] sm:$0x1] }
  0x20   : > { %953 = vmatpush.bf16.msra.mxu3 %v1413_v29  ;;  %v783_v23 = vsel %vm1584_vm2, %v778_v13, %v782_v4  ;;  %v1402_v28 = vld [vmem:[%s1733_s1 + $0x80] sm:$0xff]  ;;  %v1265_v29 = vld [vmem:[%s1548_s20 + $0x8] sm:$0xf]  ;;  %v785_v37 = vshrl.u32 %v1315_v21, 16  ;;  %v788_v38 = vshll.u32 %v1315_v21, 16  ;;  %v416_v39 = vpack.c.b16 %v409_v16, %v408_v11 }
  0x21   : > { %477 = vmatpush.bf16.msra.mxu0 %v1392_v49  ;;  %v886_v31 = vunpack.c.l.b16 %v783_v23  ;;  %v1410_v33 = vld [vmem:[%s1733_s1 + $0xc0] sm:$0xff]  ;;  %v314_v40 = vor.u32 %v313_v20, %v310_v19  ;;  %v331_v41 = vshll.u32 %v271_v24, 16  ;;  %v799_v45 = vshrl.u32 %v1317_v26, 16  ;;  %v249_v63 = vld [vmem:[%s1548_s20 + $0x28] sm:$0xf] }
  0x22   : > { %578 = vmatpush.bf16.msra.mxu1 %v1384_v50  ;;  %v1318_v44 = vld [vmem:[%s1548_s20 + $0x24] sm:$0x1]  ;;  %v328_v46 = vor.u32 %v327_v32, %v324_v25  ;;  %v787_v47 = vrot.slane %v785_v37, 4  ;;  %v790_v48 = vrot.slane %v788_v38, 5  ;;  %v802_v49 = vshll.u32 %v1317_v26, 16 }
  0x23   : > { %708 = vmatpush.bf16.msra.mxu2 %v1404_v55  ;;  %v1266_v50 = vor.u32 %v1398_v35, %v1265_v29  ;;  %v893_v51 = vpack.c.b16 %v886_v31, %v885_v30  ;;  %v801_v52 = vrot.slane %v799_v45, 4  ;;  %v794_v54 = vshll.u32 %v1316_v42, 16  ;;  %v248_v62 = vld [vmem:[%s1548_s20 + $0x20] sm:$0xf]  ;;  %v1319_v4 = vld [vmem:[%s1548_s20 + $0x28] sm:$0xf] }
  0x24   : > { %954 = vmatpush.bf16.msra.mxu3 %v1412_v56  ;;  %v791_v53 = vor.u32 %v790_v48, %v787_v47  ;;  %v804_v55 = vrot.slane %v802_v49, 5  ;;  %v808_v56 = vshll.u32 %v1318_v44, 16  ;;  %v315_v57 = vrot.slane %v314_v40, 4  ;;  %v1197_v19 = vld [vmem:[%s1548_s20 + $0x10] sm:$0xf] }
  0x25   : > { %478 = vmatpush.bf16.msra.mxu0 %v1391_v1  ;;  %v319_v58 = vrot.slane %v317_v36, 5  ;;  %v329_v59 = vrot.slane %v328_v46, 4  ;;  %v333_v60 = vrot.slane %v331_v41, 5  ;;  %v796_v1 = vrot.slane %v794_v54, 5  ;;  %v1379_v20 = vld [vmem:[%s1548_s20 + $0x14] sm:$0xf0] }
  0x26   : > { %579 = vmatpush.bf16.msra.mxu1 %v1383_v6  ;;  %v805_v61 = vor.u32 %v804_v55, %v801_v52  ;;  %v792_v0 = vrot.slane %v791_v53, 4  ;;  %v810_v3 = vrot.slane %v808_v56, 5  ;;  %v336_v6 = vshrl.u32 %v248_v62, 16  ;;  %v273_v30 = vld [vmem:[%s1548_s20 + $0x2c] sm:$0x1] }
  0x27   : > { %709 = vmatpush.bf16.msra.mxu2 %v1403_v7  ;;  %v320_v5 = vsel %vm1584_vm2, %v315_v57, %v319_v58  ;;  %v1321_v7 = vld [vmem:[%s1548_s20 + $0x30] sm:$0xf]  ;;  %v334_v8 = vsel %vm1584_vm2, %v329_v59, %v333_v60  ;;  %v339_v9 = vshll.u32 %v248_v62, 16  ;;  %v353_v11 = vshll.u32 %v249_v63, 16  ;;  %v251_v60 = vld [vmem:[%s1548_s20 + $0x38] sm:$0xf] }
  0x28   : > { %955 = vmatpush.bf16.msra.mxu3 %v1411_v10  ;;  %v806_v2 = vrot.slane %v805_v61, 4  ;;  %v350_v10 = vshrl.u32 %v249_v63, 16  ;;  %v813_v12 = vshrl.u32 %v1319_v4, 16  ;;  %v816_v13 = vshll.u32 %v1319_v4, 16  ;;  %v250_v57 = vld [vmem:[%s1548_s20 + $0x30] sm:$0xf] }
  0x29   : > { %479 = vmatpush.bf16.msra.mxu0 %v1390_v22  ;;  %v797_v14 = vsel %vm1584_vm2, %v792_v0, %v796_v1  ;;  %v827_v16 = vshrl.u32 %v1321_v7, 16  ;;  %v410_v17 = vunpack.c.l.b16 %v320_v5  ;;  %v411_v18 = vunpack.c.l.b16 %v334_v8  ;;  %v272_v22 = vld [vmem:[%s1548_s20 + $0x24] sm:$0x1]  ;;  %v1323_v61 = vld [vmem:[%s1548_s20 + $0x38] sm:$0xf] }
  0x2a   : > { %580 = vmatpush.bf16.msra.mxu1 %v1382_v27  ;;  %v811_v15 = vsel %vm1584_vm2, %v806_v2, %v810_v3  ;;  %v830_v21 = vshll.u32 %v1321_v7, 16  ;;  %v338_v23 = vrot.slane %v336_v6, 4  ;;  %v341_v24 = vrot.slane %v339_v9, 5  ;;  %v1269_v27 = vld [vmem:[%s1548_s20 + $0x18] sm:$0xf] }
  0x2b   : > { %710 = vmatpush.bf16.msra.mxu2 %v1402_v28  ;;  %v352_v25 = vrot.slane %v350_v10, 4  ;;  %v355_v26 = vrot.slane %v353_v11, 5  ;;  %v887_v28 = vunpack.c.l.b16 %v797_v14  ;;  %v888_v29 = vunpack.c.l.b16 %v811_v15  ;;  %v1325_v62 = vld [vmem:[%s1548_s20 + $0x40] sm:$0xf]  ;;  %v1380_v14 = vld [vmem:[%s1548_s20 + $0x24] sm:$0xf0] }
  0x2c   : > { %956 = vmatpush.bf16.msra.mxu3 %v1410_v33  ;;  %480 = vmatmul.bf16.vlgmr.msra.gmra.mxu0 %v416_v39  ;;  %v815_v31 = vrot.slane %v813_v12, 4  ;;  %v818_v32 = vrot.slane %v816_v13, 5  ;;  %v1399_v33 = vld [vmem:[%s1548_s20 + $0x1c] sm:$0xf0]  ;;  %v829_v35 = vrot.slane %v827_v16, 4  ;;  %v832_v36 = vrot.slane %v830_v21, 5 }
  0x2d   : > { %581 = vmatmul.bf16.vlgmr.msra.gmra.mxu1 %v1194_v34  ;;  %v1320_v34 = vld [vmem:[%s1548_s20 + $0x2c] sm:$0x1]  ;;  %v1198_v37 = vor.u32 %v1379_v20, %v1197_v19  ;;  %v345_v38 = vshll.u32 %v272_v22, 16  ;;  %v1322_v39 = vld [vmem:[%s1548_s20 + $0x34] sm:$0x1]  ;;  %v417_v40 = vpack.c.b16 %v411_v18, %v410_v17  ;;  %v342_v41 = vor.u32 %v341_v24, %v338_v23 }
  0x2e   : > { %711 = vmatmul.bf16.vlgmr.msra.gmra.mxu2 %v1266_v50  ;;  %v356_v42 = vor.u32 %v355_v26, %v352_v25  ;;  %v359_v44 = vshll.u32 %v273_v30, 16  ;;  %v1270_v45 = vor.u32 %v1399_v33, %v1269_v27  ;;  %v894_v46 = vpack.c.b16 %v888_v29, %v887_v28  ;;  %v1201_v11 = vld [vmem:[%s1548_s20 + $0x20] sm:$0xf]  ;;  %v1273_v15 = vld [vmem:[%s1548_s20 + $0x28] sm:$0xf] }
  0x2f   : > { %957 = vmatmul.bf16.vlgmr.msra.gmra.mxu3 %v893_v51  ;;  %v819_v47 = vor.u32 %v818_v32, %v815_v31  ;;  %v822_v48 = vshll.u32 %v1320_v34, 16  ;;  %v833_v49 = vor.u32 %v832_v36, %v829_v35  ;;  %v836_v50 = vshll.u32 %v1322_v39, 16  ;;  %v1400_v18 = vld [vmem:[%s1548_s20 + $0x2c] sm:$0xf0]  ;;  %v274_v21 = vld [vmem:[%s1548_s20 + $0x34] sm:$0x1] }
  0x30   : > { %v343_v51 = vrot.slane %v342_v41, 4  ;;  %v347_v52 = vrot.slane %v345_v38, 5  ;;  %v357_v53 = vrot.slane %v356_v42, 4  ;;  %v361_v54 = vrot.slane %v359_v44, 5  ;;  %v275_v24 = vld [vmem:[%s1548_s20 + $0x3c] sm:$0x1] }
  0x31   : > { %v820_v55 = vrot.slane %v819_v47, 4  ;;  %v824_v56 = vrot.slane %v822_v48, 5  ;;  %v834_v58 = vrot.slane %v833_v49, 4  ;;  %v838_v59 = vrot.slane %v836_v50, 5  ;;  %v1324_v29 = vld [vmem:[%s1548_s20 + $0x3c] sm:$0x1] }
  0x32   : > { %v348_v63 = vsel %vm1584_vm2, %v343_v51, %v347_v52  ;;  %v362_v0 = vsel %vm1584_vm2, %v357_v53, %v361_v54  ;;  %v364_v1 = vshrl.u32 %v250_v57, 16  ;;  %v367_v2 = vshll.u32 %v250_v57, 16  ;;  %v1326_v30 = vld [vmem:[%s1548_s20 + $0x44] sm:$0x1] }
  0x33   : > { %v825_v3 = vsel %vm1584_vm2, %v820_v55, %v824_v56  ;;  %v378_v4 = vshrl.u32 %v251_v60, 16  ;;  %v381_v5 = vshll.u32 %v251_v60, 16  ;;  %v841_v6 = vshrl.u32 %v1323_v61, 16 }
  0x34   : > { %v839_v7 = vsel %vm1584_vm2, %v834_v58, %v838_v59  ;;  %v844_v8 = vshll.u32 %v1323_v61, 16  ;;  %v855_v9 = vshrl.u32 %v1325_v62, 16  ;;  %v858_v10 = vshll.u32 %v1325_v62, 16  ;;  %v1205_v58 = vld [vmem:[%s1548_s20 + $0x30] sm:$0xf] }
  0x35   : > { %v412_v12 = vunpack.c.l.b16 %v348_v63  ;;  %v413_v13 = vunpack.c.l.b16 %v362_v0  ;;  %v366_v16 = vrot.slane %v364_v1, 4  ;;  %v369_v17 = vrot.slane %v367_v2, 5  ;;  %v1381_v59 = vld [vmem:[%s1548_s20 + $0x34] sm:$0xf0]  ;;  %v1401_v63 = vld [vmem:[%s1548_s20 + $0x3c] sm:$0xf0] }
  0x36   : > { %v889_v19 = vunpack.c.l.b16 %v825_v3  ;;  %v890_v20 = vunpack.c.l.b16 %v839_v7  ;;  %v380_v22 = vrot.slane %v378_v4, 4  ;;  %v383_v23 = vrot.slane %v381_v5, 5  ;;  %v1277_v62 = vld [vmem:[%s1548_s20 + $0x38] sm:$0xf] }
  0x37   : > { %v843_v25 = vrot.slane %v841_v6, 4  ;;  %v846_v26 = vrot.slane %v844_v8, 5  ;;  %v857_v27 = vrot.slane %v855_v9, 4  ;;  %v860_v28 = vrot.slane %v858_v10, 5  ;;  %v1700_v9 = vld [vmem:[%s1734_s2] ss:$0 sm:$0xff] }
  0x38   : > { %v418_v31 = vpack.c.b16 %v413_v13, %v412_v12  ;;  %v1202_v32 = vor.u32 %v1380_v14, %v1201_v11  ;;  %v1274_v33 = vor.u32 %v1400_v18, %v1273_v15  ;;  %v373_v34 = vshll.u32 %v274_v21, 16 }
  0x39   : > { %v895_v35 = vpack.c.b16 %v890_v20, %v889_v19  ;;  %v370_v36 = vor.u32 %v369_v17, %v366_v16  ;;  %v387_v38 = vshll.u32 %v275_v24, 16  ;;  %v847_v39 = vor.u32 %v846_v26, %v843_v25 }
  0x3a   : > { %v861_v41 = vor.u32 %v860_v28, %v857_v27  ;;  %v864_v42 = vshll.u32 %v1326_v30, 16  ;;  %v1206_v1 = vor.u32 %v1381_v59, %v1205_v58  ;;  %v1278_v2 = vor.u32 %v1401_v63, %v1277_v62 }
  0x3b   : > { %v371_v44 = vrot.slane %v370_v36, 4  ;;  %v389_v47 = vrot.slane %v387_v38, 5  ;;  %v848_v48 = vrot.slane %v847_v39, 4 }
  0x3c   : > { %485 = vmatmul.bf16.gmra.mxu0 %v417_v40  ;;  %v850_v40 = vshll.u32 %v1324_v29, 16  ;;  %v862_v50 = vrot.slane %v861_v41, 4  ;;  %v866_v51 = vrot.slane %v864_v42, 5 }
  0x3d   : > { %586 = vmatmul.bf16.gmra.mxu1 %v1198_v37  ;;  %v384_v37 = vor.u32 %v383_v23, %v380_v22 }
  0x3e   : > { %716 = vmatmul.bf16.gmra.mxu2 %v1270_v45  ;;  %v375_v45 = vrot.slane %v373_v34, 5  ;;  %v852_v49 = vrot.slane %v850_v40, 5  ;;  %v867_v55 = vsel %vm1584_vm2, %v862_v50, %v866_v51 }
  0x3f   : > { %962 = vmatmul.bf16.gmra.mxu3 %v894_v46  ;;  %v385_v46 = vrot.slane %v384_v37, 4  ;;  %v892_v61 = vunpack.c.l.b16 %v867_v55 }
  0x40   : > { %v376_v52 = vsel %vm1584_vm2, %v371_v44, %v375_v45  ;;  %v853_v54 = vsel %vm1584_vm2, %v848_v48, %v852_v49 }
  0x41   : > { %v390_v53 = vsel %vm1584_vm2, %v385_v46, %v389_v47  ;;  %v414_v56 = vunpack.c.l.b16 %v376_v52  ;;  %v891_v60 = vunpack.c.l.b16 %v853_v54 }
  0x42   : > { %v415_v57 = vunpack.c.l.b16 %v390_v53 }
  0x43   : > { %v896_v3 = vpack.c.b16 %v892_v61, %v891_v60 }
  0x44   : > { %v419_v0 = vpack.c.b16 %v415_v57, %v414_v56 }
  0x4c   : > { %490 = vmatmul.bf16.gmra.mxu0 %v418_v31 }
  0x4d   : > { %591 = vmatmul.bf16.gmra.mxu1 %v1202_v32 }
  0x4e   : > { %721 = vmatmul.bf16.gmra.mxu2 %v1274_v33 }
  0x4f   : > { %967 = vmatmul.bf16.gmra.mxu3 %v895_v35 }
  0x5c   : > { %495 = vmatmul.bf16.gmra.mxu0 %v419_v0 }
  0x5d   : > { %596 = vmatmul.bf16.gmra.mxu1 %v1206_v1 }
  0x5e   : > { %726 = vmatmul.bf16.gmra.mxu2 %v1278_v2 }
  0x5f   : > { %972 = vmatmul.bf16.gmra.mxu3 %v896_v3 }
  0xa9   : > { %v481_v4 = vpop.f32.mrf.mxu0 }
  0xaa   : > { %v582_v43 = vpop.f32.mrf.mxu1 }
  0xab   : > { %v583_v5 = vadd.f32 %v582_v43, %v481_v4 }
  0xb1   : > { %v712_v6 = vpop.f32.mrf.mxu2  ;;  %v483_v10 = vpop.f32.mrf.mxu0 }
  0xb2   : > { %v958_v7 = vpop.f32.mrf.mxu3  ;;  %v732_v8 = vadd.f32 %v712_v6, %v583_v5  ;;  %v584_v11 = vpop.f32.mrf.mxu1 }
  0xb3   : > { %v585_v14 = vadd.f32 %v584_v11, %v483_v10 }
  0xb4   : > { %v978_v12 = vadd.f32 %v958_v7, %v732_v8 }
  0xb6   : > { %v990_v13 = vadd.f32 %v1700_v9, %v978_v12 }
  0xb8   : > { %998 = vst [vmem:[%s1705_s21] sm:$0xff] %v990_v13 }
  0xb9   : > { %v714_v15 = vpop.f32.mrf.mxu2  ;;  %v486_v18 = vpop.f32.mrf.mxu0 }
  0xba   : > { %v960_v16 = vpop.f32.mrf.mxu3  ;;  %v733_v17 = vadd.f32 %v714_v15, %v585_v14  ;;  %v587_v19 = vpop.f32.mrf.mxu1 }
  0xbb   : > { %v588_v22 = vadd.f32 %v587_v19, %v486_v18 }
  0xbc   : > { %v979_v20 = vadd.f32 %v960_v16, %v733_v17 }
  0xbe   : > { %v991_v21 = vadd.f32 %v1700_v9, %v979_v20 }
  0xc0   : > { %999 = vst [vmem:[%s1705_s21 + $0x8] sm:$0xff] %v991_v21 }
  0xc1   : > { %v717_v23 = vpop.f32.mrf.mxu2  ;;  %v488_v26 = vpop.f32.mrf.mxu0 }
  0xc2   : > { %v963_v24 = vpop.f32.mrf.mxu3  ;;  %v734_v25 = vadd.f32 %v717_v23, %v588_v22  ;;  %v589_v27 = vpop.f32.mrf.mxu1 }
  0xc3   : > { %v590_v30 = vadd.f32 %v589_v27, %v488_v26 }
  0xc4   : > { %v980_v28 = vadd.f32 %v963_v24, %v734_v25 }
  0xc6   : > { %v992_v29 = vadd.f32 %v1700_v9, %v980_v28 }
  0xc8   : > { %1000 = vst [vmem:[%s1705_s21 + $0x10] sm:$0xff] %v992_v29 }
  0xc9   : > { %v719_v31 = vpop.f32.mrf.mxu2  ;;  %v491_v34 = vpop.f32.mrf.mxu0 }
  0xca   : > { %v965_v32 = vpop.f32.mrf.mxu3  ;;  %v735_v33 = vadd.f32 %v719_v31, %v590_v30  ;;  %v592_v35 = vpop.f32.mrf.mxu1 }
  0xcb   : > { %v593_v38 = vadd.f32 %v592_v35, %v491_v34 }
  0xcc   : > { %v981_v36 = vadd.f32 %v965_v32, %v735_v33 }
  0xce   : > { %v993_v37 = vadd.f32 %v1700_v9, %v981_v36 }
  0xd0   : > { %1001 = vst [vmem:[%s1705_s21 + $0x18] sm:$0xff] %v993_v37 }
  0xd1   : > { %v722_v39 = vpop.f32.mrf.mxu2  ;;  %v493_v42 = vpop.f32.mrf.mxu0 }
  0xd2   : > { %v968_v40 = vpop.f32.mrf.mxu3  ;;  %v736_v41 = vadd.f32 %v722_v39, %v593_v38  ;;  %v594_v44 = vpop.f32.mrf.mxu1 }
  0xd3   : > { %v595_v47 = vadd.f32 %v594_v44, %v493_v42 }
  0xd4   : > { %v982_v45 = vadd.f32 %v968_v40, %v736_v41 }
  0xd6   : > { %v994_v46 = vadd.f32 %v1700_v9, %v982_v45 }
  0xd8   : > { %1002 = vst [vmem:[%s1705_s21 + $0x20] sm:$0xff] %v994_v46 }
  0xd9   : > { %v724_v48 = vpop.f32.mrf.mxu2  ;;  %v496_v51 = vpop.f32.mrf.mxu0 }
  0xda   : > { %v970_v49 = vpop.f32.mrf.mxu3  ;;  %v737_v50 = vadd.f32 %v724_v48, %v595_v47  ;;  %v597_v52 = vpop.f32.mrf.mxu1 }
  0xdb   : > { %v598_v55 = vadd.f32 %v597_v52, %v496_v51 }
  0xdc   : > { %v983_v53 = vadd.f32 %v970_v49, %v737_v50 }
  0xde   : > { %v995_v54 = vadd.f32 %v1700_v9, %v983_v53 }
  0xe0   : > { %1003 = vst [vmem:[%s1705_s21 + $0x28] sm:$0xff] %v995_v54 }
  0xe1   : > { %v727_v56 = vpop.f32.mrf.mxu2  ;;  %v498_v60 = vpop.f32.mrf.mxu0 }
  0xe2   : > { %v973_v57 = vpop.f32.mrf.mxu3  ;;  %v738_v58 = vadd.f32 %v727_v56, %v598_v55  ;;  %v599_v61 = vpop.f32.mrf.mxu1 }
  0xe3   : > { %v600_v63 = vadd.f32 %v599_v61, %v498_v60 }
  0xe4   : > { %v984_v59 = vadd.f32 %v973_v57, %v738_v58 }
  0xe6   : > { %v996_v62 = vadd.f32 %v1700_v9, %v984_v59 }
  0xe8   : > { %1004 = vst [vmem:[%s1705_s21 + $0x30] sm:$0xff] %v996_v62 }
  0xe9   : > { %v729_v0 = vpop.f32.mrf.mxu2 }
  0xea   : > { %v739_v1 = vadd.f32 %v729_v0, %v600_v63  ;;  %v975_v2 = vpop.f32.mrf.mxu3 }
  0xec   : > { %v985_v3 = vadd.f32 %v975_v2, %v739_v1 }
  0xee   : > { %v997_v4 = vadd.f32 %v1700_v9, %v985_v3 }
  0xf0   : > { %1005 = vst [vmem:[%s1705_s21 + $0x38] sm:$0xff] %v997_v4 }
  0xf1 PF: > { %s13_s14 = sadd.s32 1, %s1466_s14   ;;  %s1738_s12 = smov %s1462_s13 }
  0xf2   : > { %p10_p5 = scmp.ge.s32.totalorder %s13_s14, 4   ;;  %s1739_s13 = smov %s1741_s15 }
  0xf4   :  { %12 = sbr.rel (!%p10_p5) target bundleno = 2 (0x2), region = 73 }

</bundles_post_ra>
